<compile_context>
chip_gen: v7x
topology: tpu7x:2x2x1
jax: 0.10.0
libtpu: 0.0.40
codegen_flags: <defaults>
</compile_context>

<pallas_src>
import functools

import jax
import jax.numpy as jnp
from jax import lax
from jax.experimental import pallas as pl
from jax.experimental.pallas import tpu as pltpu


def _round_up(v, m):
    return ((v + m - 1) // m) * m


# ----------------------------------------------------------------------------
# Pallas kernels: fused Linear (patch projection) + LayerNorm
# ----------------------------------------------------------------------------
def _layernorm_rows(y, g, beta, *, eps, e_real):
    """LayerNorm over the last axis. Padded lanes of y must be exactly 0
    (zero weight columns + zero bias), so dividing the raw sums by the *real*
    E gives correct statistics with no masking. gamma/beta are 0 in padded
    lanes, so padded output lanes come out exactly 0."""
    inv_e = 1.0 / float(e_real)
    s1 = jnp.sum(y, axis=-1, keepdims=True)
    s2 = jnp.sum(y * y, axis=-1, keepdims=True)
    mean = s1 * inv_e
    var = s2 * inv_e - mean * mean              # biased variance (nn.LayerNorm)
    y_hat = (y - mean) * lax.rsqrt(var + eps)
    return y_hat * g + beta


def _proj_norm_kernel_noktile(x_ref, w_ref, b_ref, g_ref, beta_ref, o_ref, *,
                              eps, e_real):
    # x_ref: (tm, F_pad) bf16, w_ref: (F_pad, E_pad) bf16 (resident),
    # b/g/beta: (1, E_pad) f32, o_ref: (tm, E_pad) f32.
    y = jnp.dot(x_ref[...], w_ref[...], preferred_element_type=jnp.float32)
    y = y + b_ref[...]
    o_ref[...] = _layernorm_rows(y, g_ref[...], beta_ref[...],
                                 eps=eps, e_real=e_real).astype(o_ref.dtype)


def _proj_norm_kernel_ktile(x_ref, w_ref, b_ref, g_ref, beta_ref, o_ref,
                            acc_ref, *, eps, e_real):
    # K-tiled variant: f32 accumulator scratch persists across the k axis.
    k = pl.program_id(1)

    @pl.when(k == 0)
    def _():
        acc_ref[...] = jnp.zeros_like(acc_ref)

    acc_ref[...] += jnp.dot(x_ref[...], w_ref[...],
                            preferred_element_type=jnp.float32)

    @pl.when(k == pl.num_programs(1) - 1)
    def _():
        y = acc_ref[...] + b_ref[...]
        o_ref[...] = _layernorm_rows(y, g_ref[...], beta_ref[...],
                                     eps=eps, e_real=e_real).astype(o_ref.dtype)


# ----------------------------------------------------------------------------
# Tile selection + pallas_call wrapper
# ----------------------------------------------------------------------------
def _choose_tm(m, tm_max=512, target_steps=8):
    """Large row tiles, but keep >= target_steps grid steps when M is large so
    v7x's 2 TensorCores both get work. For tiny M, one full-height tile."""
    if m <= 128:
        return _round_up(m, 8)
    tm = max(128, min(tm_max, (m + target_steps - 1) // target_steps))
    return _round_up(tm, 8)


def _vmem_need(tm, tk, e_pad, *, ktiled):
    # double-buffered bf16 x/w tiles + double-buffered f32 out tile
    # + LN params (+ f32 accumulator scratch when K-tiled)
    need = (2 * (tm * tk * 2 + tk * e_pad * 2)
            + 2 * tm * e_pad * 4
            + 3 * 2 * e_pad * 4)
    if ktiled:
        need += tm * e_pad * 4
    return need


def proj_layernorm(patches_2d, w, b, gamma, beta, *, eps=1e-5,
                   tm_max=512, vmem_budget=20 << 20):
    """patches_2d: (M, F) -> LayerNorm(patches_2d @ w + b) : (M, E) f32."""
    M, F = patches_2d.shape
    E = w.shape[1]

    F_pad = _round_up(F, 128)                  # aligned MXU K / full vregs
    E_pad = _round_up(E, 128)                  # lane-dense output stores
    tm = _choose_tm(M, tm_max)

    # Prefer no K-loop (whole weight resident); otherwise the largest
    # 128-multiple *divisor* of F_pad that fits the VMEM budget.
    def pick_tk(tm_):
        n_chunks = F_pad // 128
        for steps in range(1, n_chunks + 1):
            if n_chunks % steps:
                continue
            tk_ = (n_chunks // steps) * 128
            if _vmem_need(tm_, tk_, E_pad, ktiled=(steps > 1)) <= vmem_budget:
                return tk_
        return 128

    tk = pick_tk(tm)
    while (_vmem_need(tm, tk, E_pad, ktiled=(F_pad // tk > 1)) > vmem_budget
           and tm > 8):
        tm = max(8, _round_up(tm // 2, 8))
        tk = pick_tk(tm)

    M_pad = _round_up(M, tm)
    grid_k = F_pad // tk
    single_k = grid_k == 1
    grid_m = M_pad // tm

    # bf16 MXU operands (f32 accumulation inside the kernel).
    x = patches_2d if patches_2d.dtype == jnp.bfloat16 \
        else patches_2d.astype(jnp.bfloat16)
    if (M_pad, F_pad) != (M, F):
        x = jnp.pad(x, ((0, M_pad - M), (0, F_pad - F)))
    wq = w.astype(jnp.bfloat16)
    if (F_pad, E_pad) != (F, E):
        wq = jnp.pad(wq, ((0, F_pad - F), (0, E_pad - E)))
    b2 = jnp.pad(b.astype(jnp.float32), (0, E_pad - E)).reshape(1, E_pad)
    g2 = jnp.pad(gamma.astype(jnp.float32), (0, E_pad - E)).reshape(1, E_pad)
    be2 = jnp.pad(beta.astype(jnp.float32), (0, E_pad - E)).reshape(1, E_pad)

    if single_k:
        kernel = functools.partial(_proj_norm_kernel_noktile, eps=eps, e_real=E)
        grid = (grid_m,)
        in_specs = [
            pl.BlockSpec((tm, F_pad), lambda i: (i, 0)),     # patch rows
            pl.BlockSpec((F_pad, E_pad), lambda i: (0, 0)),  # weight (resident)
            pl.BlockSpec((1, E_pad), lambda i: (0, 0)),      # proj bias
            pl.BlockSpec((1, E_pad), lambda i: (0, 0)),      # LN gamma
            pl.BlockSpec((1, E_pad), lambda i: (0, 0)),      # LN beta
        ]
        out_specs = pl.BlockSpec((tm, E_pad), lambda i: (i, 0))
        scratch_shapes = []
        dims = ("parallel",)
        w_bytes = wq.size * wq.dtype.itemsize            # fetched once
    else:
        kernel = functools.partial(_proj_norm_kernel_ktile, eps=eps, e_real=E)
        grid = (grid_m, grid_k)
        in_specs = [
            pl.BlockSpec((tm, tk), lambda i, k: (i, k)),
            pl.BlockSpec((tk, E_pad), lambda i, k: (k, 0)),
            pl.BlockSpec((1, E_pad), lambda i, k: (0, 0)),
            pl.BlockSpec((1, E_pad), lambda i, k: (0, 0)),
            pl.BlockSpec((1, E_pad), lambda i, k: (0, 0)),
        ]
        out_specs = pl.BlockSpec((tm, E_pad), lambda i, k: (i, 0))
        scratch_shapes = [pltpu.VMEM((tm, E_pad), jnp.float32)]
        dims = ("parallel", "arbitrary")
        w_bytes = wq.size * wq.dtype.itemsize * grid_m   # re-fetched per i

    cost = pl.CostEstimate(
        flops=2 * M_pad * F_pad * E_pad,
        transcendentals=M_pad,                           # one rsqrt per row
        bytes_accessed=(x.size * x.dtype.itemsize + w_bytes
                        + M_pad * E_pad * 4 + 3 * E_pad * 4),
    )

    vmem_need = _vmem_need(tm, tk, E_pad, ktiled=not single_k)
    cp_kwargs = dict(dimension_semantics=dims)
    if vmem_need > (12 << 20):                 # stay safe vs. v5e's 16 MiB default
        cp_kwargs["vmem_limit_bytes"] = min(int(vmem_need * 1.3), 56 << 20)

    out = pl.pallas_call(
        kernel,
        out_shape=jax.ShapeDtypeStruct((M_pad, E_pad), jnp.float32),
        grid_spec=pltpu.PrefetchScalarGridSpec(
            num_scalar_prefetch=0,
            grid=grid,
            in_specs=in_specs,
            out_specs=out_specs,
            scratch_shapes=scratch_shapes,
        ),
        compiler_params=pltpu.CompilerParams(**cp_kwargs),
        cost_estimate=cost,
    )(x, wq, b2, g2, be2)

    if (M_pad, E_pad) != (M, E):
        out = out[:M, :E]
    return out


# ----------------------------------------------------------------------------
# Glue (plain JAX, bf16): shifted images via one pad + static slices, unfold.
# TODO(synk): the shift/unfold stage is pure data layout and stays in XLA; at
# real image sizes it could be fused into the kernel with manual DMA gathers.
# ----------------------------------------------------------------------------
def _shifted_images(x, bias_offsets):
    # torch.roll((dx,dy)) + zeroing the wrapped border == a static window of a
    # single zero-padded copy of x, starting at (max_dx - dx, max_dy - dy).
    B, C, H, W = x.shape
    if not bias_offsets:
        return [x]
    max_dx = max(abs(dx) for dx, _ in bias_offsets)
    max_dy = max(abs(dy) for _, dy in bias_offsets)
    xp = jnp.pad(x, ((0, 0), (0, 0), (max_dx, max_dx), (max_dy, max_dy)))
    imgs = [x]
    for dx, dy in bias_offsets:
        r0 = max_dx - dx
        c0 = max_dy - dy
        imgs.append(lax.slice(xp, (0, 0, r0, c0), (B, C, r0 + H, c0 + W)))
    return imgs


def _unfold_patches(img, p):
    # (B, C, H, W) -> (B, num_patches, p*p, C), feature order (i, j, c).
    B, C, H, W = img.shape
    t = img.reshape(B, C, H // p, p, W // p, p)
    t = jnp.transpose(t, (0, 2, 4, 3, 5, 1))          # (B, ph, pw, i, j, C)
    return t.reshape(B, (H // p) * (W // p), p * p, C)


def enhanced_patch_embedding(x, params, *, patch_size, bias_offsets):
    """x: (B, C, H, W) -> (B, num_patches, embed_dim)."""
    B, C, H, W = x.shape
    p = patch_size

    # Cast once; all ops before the matmul are pure layout, so casting here is
    # value-identical to casting right before the matmul, at half the traffic.
    xb = x.astype(jnp.bfloat16)
    imgs = _shifted_images(xb, bias_offsets)
    n_img = len(imgs)

    # Per-image patch slabs stacked along the feature axis; final feature
    # order is (i*p + j)*(n_img*C) + g*C + c, matching the PyTorch
    # unfold/unfold/view/permute/view + channel-concat order.
    slabs = [_unfold_patches(im, p) for im in imgs]    # (B, NP, p*p, C) each
    patches = jnp.stack(slabs, axis=3)                 # (B, NP, p*p, n_img, C)
    num_patches = (H // p) * (W // p)
    feat = p * p * n_img * C
    patches = patches.reshape(B, num_patches, feat)

    w, b, gamma, beta = params
    M = B * num_patches
    out2d = proj_layernorm(patches.reshape(M, feat), w, b, gamma, beta)
    return out2d.reshape(B, num_patches, w.shape[1])


# ----------------------------------------------------------------------------
# Pure-JAX reference (direct translation of the PyTorch module)
# ----------------------------------------------------------------------------
def _reference(x, params, *, patch_size, bias_offsets, eps=1e-5,
               matmul_dtype=jnp.float32):
    B, C, H, W = x.shape
    p = patch_size
    biased = [x]
    for dx, dy in bias_offsets:
        rolled = jnp.roll(x, shift=(dx, dy), axis=(2, 3))
        row = jnp.arange(H)[:, None]
        col = jnp.arange(W)[None, :]
        mask = jnp.ones((H, W), dtype=bool)
        if dx > 0:
            mask = mask & (row >= dx)
        elif dx < 0:
            mask = mask & (row < H + dx)
        if dy > 0:
            mask = mask & (col >= dy)
        elif dy < 0:
            mask = mask & (col < W + dy)
        biased.append(jnp.where(mask[None, None], rolled, 0.0))
    stacked = jnp.concatenate(biased, axis=1)
    CC = stacked.shape[1]
    pt = stacked.reshape(B, CC, H // p, p, W // p, p)
    pt = jnp.transpose(pt, (0, 2, 4, 3, 5, 1)).reshape(B, -1, p * p * CC)
    w, b, gamma, beta = params
    y = jnp.dot(pt.astype(matmul_dtype), w.astype(matmul_dtype),
                preferred_element_type=jnp.float32) + b
    mean = jnp.mean(y, axis=-1, keepdims=True)
    var = jnp.mean((y - mean) ** 2, axis=-1, keepdims=True)
    return (y - mean) / jnp.sqrt(var + eps) * gamma + beta


if __name__ == "__main__":
    # Small, forward-consistent shapes: img 16x16, patch 4, 4 input channels,
    # default-style bias offsets (shift magnitude 4). embed_dim=128 keeps the
    # output lane-dense (the module default 768 is also a multiple of 128).
    B, C, H, W = 2, 4, 16, 16
    patch_size = 4
    embed_dim = 128
    bias_offsets = [(0, 4), (4, 0), (0, -4), (-4, 0)]

    n_img = 1 + len(bias_offsets)
    feat = patch_size * patch_size * C * n_img        # 4*4*4*5 = 320

    key = jax.random.PRNGKey(0)
    kx, kw, kb = jax.random.split(key, 3)
    x = jax.random.normal(kx, (B, C, H, W), dtype=jnp.float32)

    # Deterministic parameter init (nn.Linear-style uniform bound).
    bound = 1.0 / (feat ** 0.5)
    w = jax.random.uniform(kw, (feat, embed_dim), jnp.float32, -bound, bound)
    b = jax.random.uniform(kb, (embed_dim,), jnp.float32, -bound, bound)
    gamma = jnp.ones((embed_dim,), jnp.float32)       # nn.LayerNorm init
    beta = jnp.zeros((embed_dim,), jnp.float32)
    params = (w, b, gamma, beta)

    fwd = jax.jit(functools.partial(enhanced_patch_embedding,
                                    patch_size=patch_size,
                                    bias_offsets=bias_offsets))
    out = jax.block_until_ready(fwd(x, params))

    assert out.shape == (B, (H // patch_size) * (W // patch_size), embed_dim)

    # Strict check vs. a reference using the same bf16 MXU operands.
    ref_bf16 = _reference(x, params, patch_size=patch_size,
                          bias_offsets=bias_offsets,
                          matmul_dtype=jnp.bfloat16)
    assert jnp.allclose(out, ref_bf16, atol=2e-3, rtol=2e-3), \
        float(jnp.max(jnp.abs(out - ref_bf16)))

    # Looser sanity check vs. the full-f32 reference (bf16 matmul rounding).
    ref_f32 = _reference(x, params, patch_size=patch_size,
                         bias_offsets=bias_offsets,
                         matmul_dtype=jnp.float32)
    assert jnp.allclose(out, ref_f32, atol=6e-2, rtol=6e-2)

    print("KERNEL_OK")
</pallas_src>

<mosaic_0001>
module attributes {stable_mosaic.version = 11 : i64} {
  func.func @_proj_norm_kernel_noktile(%arg0: i32, %arg1: memref<32x384xbf16, #tpu.memory_space<vmem>>, %arg2: memref<384x128xbf16, #tpu.memory_space<vmem>>, %arg3: memref<1x128xf32, #tpu.memory_space<vmem>>, %arg4: memref<1x128xf32, #tpu.memory_space<vmem>>, %arg5: memref<1x128xf32, #tpu.memory_space<vmem>>, %arg6: memref<32x128xf32, #tpu.memory_space<vmem>>) attributes {dimension_semantics = [#tpu.dimension_semantics<parallel>], iteration_bounds = array<i64: 1>, scalar_prefetch = 0 : i64, scratch_operands = 0 : i64, tpu.core_type = #tpu.core_type<tc>, window_params = [{transform_indices = @transform_0, window_bounds = array<i64: 32, 384>}, {pipeline_mode = #tpu.pipeline_mode<synchronous>, transform_indices = @transform_1, window_bounds = array<i64: 384, 128>}, {pipeline_mode = #tpu.pipeline_mode<synchronous>, transform_indices = @transform_2, window_bounds = array<i64: 1, 128>}, {pipeline_mode = #tpu.pipeline_mode<synchronous>, transform_indices = @transform_3, window_bounds = array<i64: 1, 128>}, {pipeline_mode = #tpu.pipeline_mode<synchronous>, transform_indices = @transform_4, window_bounds = array<i64: 1, 128>}, {transform_indices = @transform_5, window_bounds = array<i64: 32, 128>}]} {
    %c0 = arith.constant 0 : index
    %c0_0 = arith.constant 0 : index
    %0 = vector.load %arg1[%c0, %c0_0] : memref<32x384xbf16, #tpu.memory_space<vmem>>, vector<32x384xbf16>
    %c0_1 = arith.constant 0 : index
    %c0_2 = arith.constant 0 : index
    %1 = vector.load %arg2[%c0_1, %c0_2] : memref<384x128xbf16, #tpu.memory_space<vmem>>, vector<384x128xbf16>
    %cst = arith.constant dense<0.000000e+00> : vector<32x128xf32>
    %2 = tpu.matmul %0, %1, %cst {dimension_numbers = #tpu.dot_dimension_numbers<[1], [0], [0], [1], [0, 0, 1, 1], [], []>} : vector<32x384xbf16>, vector<384x128xbf16>, vector<32x128xf32> -> vector<32x128xf32>
    %c0_3 = arith.constant 0 : index
    %c0_4 = arith.constant 0 : index
    %3 = vector.load %arg3[%c0_3, %c0_4] : memref<1x128xf32, #tpu.memory_space<vmem>>, vector<1x128xf32>
    %4 = vector.broadcast %3 : vector<1x128xf32> to vector<32x128xf32>
    %5 = arith.addf %2, %4 : vector<32x128xf32>
    %c0_5 = arith.constant 0 : index
    %c0_6 = arith.constant 0 : index
    %6 = vector.load %arg4[%c0_5, %c0_6] : memref<1x128xf32, #tpu.memory_space<vmem>>, vector<1x128xf32>
    %c0_7 = arith.constant 0 : index
    %c0_8 = arith.constant 0 : index
    %7 = vector.load %arg5[%c0_7, %c0_8] : memref<1x128xf32, #tpu.memory_space<vmem>>, vector<1x128xf32>
    %cst_9 = arith.constant dense<0.000000e+00> : vector<32xf32>
    %8 = vector.multi_reduction <add>, %5, %cst_9 [1] : vector<32x128xf32> to vector<32xf32>
    %9 = vector.shape_cast %8 : vector<32xf32> to vector<32x1xf32>
    %10 = arith.mulf %5, %5 : vector<32x128xf32>
    %cst_10 = arith.constant dense<0.000000e+00> : vector<32xf32>
    %11 = vector.multi_reduction <add>, %10, %cst_10 [1] : vector<32x128xf32> to vector<32xf32>
    %12 = vector.shape_cast %11 : vector<32xf32> to vector<32x1xf32>
    %cst_11 = arith.constant 7.812500e-03 : f32
    %13 = vector.broadcast %cst_11 : f32 to vector<32x1xf32>
    %14 = arith.mulf %9, %13 : vector<32x1xf32>
    %cst_12 = arith.constant 7.812500e-03 : f32
    %15 = vector.broadcast %cst_12 : f32 to vector<32x1xf32>
    %16 = arith.mulf %12, %15 : vector<32x1xf32>
    %17 = arith.mulf %14, %14 : vector<32x1xf32>
    %18 = arith.subf %16, %17 : vector<32x1xf32>
    %19 = vector.broadcast %14 : vector<32x1xf32> to vector<32x128xf32>
    %20 = arith.subf %5, %19 : vector<32x128xf32>
    %cst_13 = arith.constant 9.99999974E-6 : f32
    %21 = vector.broadcast %cst_13 : f32 to vector<32x1xf32>
    %22 = arith.addf %18, %21 : vector<32x1xf32>
    %23 = math.rsqrt %22 : vector<32x1xf32>
    %24 = vector.broadcast %23 : vector<32x1xf32> to vector<32x128xf32>
    %25 = arith.mulf %20, %24 : vector<32x128xf32>
    %26 = vector.broadcast %6 : vector<1x128xf32> to vector<32x128xf32>
    %27 = arith.mulf %25, %26 : vector<32x128xf32>
    %28 = vector.broadcast %7 : vector<1x128xf32> to vector<32x128xf32>
    %29 = arith.addf %27, %28 : vector<32x128xf32>
    %c0_14 = arith.constant 0 : index
    %c0_15 = arith.constant 0 : index
    %30 = vector.load %arg6[%c0_14, %c0_15] : memref<32x128xf32, #tpu.memory_space<vmem>>, vector<32x128xf32>
    tpu.vector_store %arg6[%c0_14, %c0_15], %29 {strides = array<i32>} : memref<32x128xf32, #tpu.memory_space<vmem>>, vector<32x128xf32>,
    return
  }
  func.func @transform_0(%arg0: i32) -> (i32, i32) {
    %c0_i32 = arith.constant 0 : i32
    %c0_i32_0 = arith.constant 0 : i32
    return %arg0, %c0_i32 : i32, i32
  }
  func.func @transform_1(%arg0: i32) -> (i32, i32) {
    %c0_i32 = arith.constant 0 : i32
    %c0_i32_0 = arith.constant 0 : i32
    %c0_i32_1 = arith.constant 0 : i32
    return %c0_i32, %c0_i32_0 : i32, i32
  }
  func.func @transform_2(%arg0: i32) -> (i32, i32) {
    %c0_i32 = arith.constant 0 : i32
    %c0_i32_0 = arith.constant 0 : i32
    %c0_i32_1 = arith.constant 0 : i32
    return %c0_i32, %c0_i32_0 : i32, i32
  }
  func.func @transform_3(%arg0: i32) -> (i32, i32) {
    %c0_i32 = arith.constant 0 : i32
    %c0_i32_0 = arith.constant 0 : i32
    %c0_i32_1 = arith.constant 0 : i32
    return %c0_i32, %c0_i32_0 : i32, i32
  }
  func.func @transform_4(%arg0: i32) -> (i32, i32) {
    %c0_i32 = arith.constant 0 : i32
    %c0_i32_0 = arith.constant 0 : i32
    %c0_i32_1 = arith.constant 0 : i32
    return %c0_i32, %c0_i32_0 : i32, i32
  }
  func.func @transform_5(%arg0: i32) -> (i32, i32) {
    %c0_i32 = arith.constant 0 : i32
    %c0_i32_0 = arith.constant 0 : i32
    return %arg0, %c0_i32 : i32, i32
  }
}

</mosaic_0001>

<bundles_post_ra>
// kernel: enhanced_patch_embedding.1
= control target key start
LH: loop header
LB: loop body
LE: loop exit
PB: predicated region body
PF: predicated region fallthrough
CT: control target
= control target key end

     0   :  { %s761_s0 = inlined_call_operand.vmem [shape: bf16[32,384], index: 0, kind: input, shape index: {}]   ;;  %s762_s1 = inlined_call_operand.vmem [shape: bf16[384,128], index: 1, kind: input, shape index: {}]   ;;  %s763_s2 = inlined_call_operand.vmem [shape: f32[1,128], index: 2, kind: input, shape index: {}]   ;;  %s764_s3 = inlined_call_operand.vmem [shape: f32[1,128], index: 3, kind: input, shape index: {}]   ;;  %s765_s4 = inlined_call_operand.vmem [shape: f32[1,128], index: 4, kind: input, shape index: {}]   ;;  %s766_s5 = inlined_call_operand.hbm [shape: f32[32,128], index: 5, kind: output, shape index: {}]  }
   0x1   :  { %v547_v0 = vld [vmem:[%s762_s1 + $0x40] sm:$0xff]   ;;  %v550_v3 = vld [vmem:[%s762_s1 + $0x48] sm:$0xff]   ;;  %v553_v6 = vld [vmem:[%s762_s1 + $0x50] sm:$0xff]  }
   0x2   :  { %v548_v1 = vld [vmem:[%s762_s1] sm:$0xff]   ;;  %486 = vmatprep.subr.bf16.mxu0 %v547_v0  ;;  %v551_v4 = vld [vmem:[%s762_s1 + $0x8] sm:$0xff]   ;;  %v554_v7 = vld [vmem:[%s762_s1 + $0x10] sm:$0xff]  }
   0x3   :  { %v549_v2 = vld [vmem:[%s762_s1 + $0x80] sm:$0xff]   ;;  %487 = vmatpush3.bf16.msra.mxu0 %v548_v1  ;;  %v552_v5 = vld [vmem:[%s762_s1 + $0x88] sm:$0xff]   ;;  %v555_v8 = vld [vmem:[%s762_s1 + $0x90] sm:$0xff]  }
   0x4   :  { %524 = vmatprep.subr.bf16.mxu1 %v549_v2  ;;  %488 = vmatprep.subr.bf16.mxu0 %v550_v3  ;;  %v556_v9 = vld [vmem:[%s762_s1 + $0x58] sm:$0xff]   ;;  %v559_v12 = vld [vmem:[%s762_s1 + $0x60] sm:$0xff]   ;;  %v562_v15 = vld [vmem:[%s762_s1 + $0x68] sm:$0xff]  }
   0x5   :  { %525 = vmatpush3.bf16.msra.mxu1 %v549_v2  ;;  %v557_v10 = vld [vmem:[%s762_s1 + $0x18] sm:$0xff]   ;;  %v561_v13 = vld [vmem:[%s762_s1 + $0xa0] sm:$0xff]   ;;  %v564_v16 = vld [vmem:[%s762_s1 + $0xa8] sm:$0xff]  }
   0x6   :  { %526 = vmatprep.subr.bf16.mxu1 %v552_v5  ;;  %v558_v11 = vld [vmem:[%s762_s1 + $0x98] sm:$0xff]   ;;  %v560_v14 = vld [vmem:[%s762_s1 + $0x20] sm:$0xff]   ;;  %v563_v17 = vld [vmem:[%s762_s1 + $0x28] sm:$0xff]  }
   0x7   :  { %489 = vmatpush3.bf16.msra.mxu0 %v551_v4  ;;  %v565_v18 = vld [vmem:[%s762_s1 + $0x70] sm:$0xff]   ;;  %v568_v21 = vld [vmem:[%s762_s1 + $0x78] sm:$0xff]  }
   0x8   :  { %490 = vmatprep.subr.bf16.mxu0 %v553_v6  ;;  %v566_v19 = vld [vmem:[%s762_s1 + $0x30] sm:$0xff]   ;;  %v570_v22 = vld [vmem:[%s762_s1 + $0xb8] sm:$0xff]  }
   0x9   :  { %527 = vmatpush3.bf16.msra.mxu1 %v552_v5  ;;  %v567_v20 = vld [vmem:[%s762_s1 + $0xb0] sm:$0xff]   ;;  %v569_v25 = vld [vmem:[%s762_s1 + $0x38] sm:$0xff]  }
   0xa   :  { %528 = vmatprep.subr.bf16.mxu1 %v555_v8  ;;  %v573_v23 = vld [vmem:[%s761_s0 + $0x4] ss:$12 sps:$4 sm:$0xff]   ;;  %v574_v24 = vld [vmem:[%s761_s0 + $0x8] ss:$12 sps:$4 sm:$0xff]  }
   0xb   :  { %491 = vmatpush3.bf16.msra.mxu0 %v554_v7  ;;  %293 = vmatprep.mubr.bf16.mxu0 %v573_v23 }
   0xc   :  { %492 = vmatprep.subr.bf16.mxu0 %v556_v9  ;;  %540 = vmatprep.mubr.bf16.mxu1 %v574_v24 }
   0xd   :  { %529 = vmatpush3.bf16.msra.mxu1 %v555_v8 }
   0xe   :  { %530 = vmatprep.subr.bf16.mxu1 %v558_v11 }
   0xf   :  { %493 = vmatpush3.bf16.msra.mxu0 %v557_v10 }
  0x10   :  { %494 = vmatprep.subr.bf16.mxu0 %v559_v12 }
  0x11   :  { %531 = vmatpush3.bf16.msra.mxu1 %v558_v11 }
  0x12   :  { %532 = vmatprep.subr.bf16.mxu1 %v561_v13 }
  0x13   :  { %495 = vmatpush3.bf16.msra.mxu0 %v560_v14 }
  0x14   :  { %496 = vmatprep.subr.bf16.mxu0 %v562_v15 }
  0x15   :  { %533 = vmatpush3.bf16.msra.mxu1 %v561_v13 }
  0x16   :  { %534 = vmatprep.subr.bf16.mxu1 %v564_v16 }
  0x17   :  { %497 = vmatpush3.bf16.msra.mxu0 %v563_v17 }
  0x18   :  { %498 = vmatprep.subr.bf16.mxu0 %v565_v18 }
  0x19   :  { %535 = vmatpush3.bf16.msra.mxu1 %v564_v16 }
  0x1a   :  { %536 = vmatprep.subr.bf16.mxu1 %v567_v20 }
  0x1b   :  { %499 = vmatpush3.bf16.msra.mxu0 %v566_v19 }
  0x1c   :  { %500 = vmatprep.subr.bf16.mxu0 %v568_v21 }
  0x1d   :  { %10 = vsyncpa [#allocation3], 0  ;;  %537 = vmatpush3.bf16.msra.mxu1 %v567_v20  ;;  %v571_v26 = vld [vmem:[%s761_s0] ss:$12 sps:$4 sm:$0xff]   ;;  %v576_v27 = vld [vmem:[%s761_s0 + $0x1c] ss:$12 sps:$4 sm:$0xff]  }
  0x1e   :  { %538 = vmatprep.subr.bf16.mxu1 %v570_v22  ;;  %v575_v28 = vld [vmem:[%s761_s0 + $0x20] ss:$12 sps:$4 sm:$0xff]   ;;  %v578_v29 = vld [vmem:[%s761_s0 + $0x18] ss:$12 sps:$4 sm:$0xff]  }
  0x1f   :  { %501 = vmatpush3.bf16.msra.mxu0 %v569_v25  ;;  %v453_v32 = vld [vmem:[%s763_s2] ss:$0 sm:$0xff] }
  0x20   :  { %v484_v25 = vld [vmem:[%s764_s3] ss:$0 sm:$0xff]  ;;  %s611_s3 = smov [#allocation2]  }
  0x21   :  { %539 = vmatpush3.bf16.msra.mxu1 %v570_v22  ;;  %s442_s6 = sshll.u32 %s611_s3, 4  ;;  %s443_s6 = int_to_ptr.vmem [resolvable:$true] %s442_s6 }
  0x22   :  { %294 = vmatmul.mubr.bf16.vlgmr.msra.gmra.mrb[0].mxu0 %v571_v26  ;;  %p592_p1 = scmp.lt.s32.totalorder %s443_s6, %s443_s6 }
  0x23   :  { %301 = vmatprep.mubr.bf16.mxu0 %v576_v27 }
  0x24   :  { %541 = vmatmul.mubr.bf16.vlgmr.msra.gmra.mrb[0].mxu1 %v575_v28 }
  0x2a   :  { %302 = vmatmul.mubr.bf16.gmra.mrb[4].mxu0 %v578_v29  ;;  %v485_v29 = vld [vmem:[%s765_s4] ss:$0 sm:$0xff]  ;;  %s587_s4 = scalar_lea.vmem %s443_s6, 512 }
  0x2b   :  { %p588_p0 = scmp.ne.s32.totalorder %s443_s6, %s587_s4  ;;  %p593_p2 = scmp.lt.s32.totalorder %s587_s4, %s587_s4 }
  0x2d   :  { %p594_p3 = por %p593_p2, %p592_p1 }
  0x2f   :  { %p595_p4 = pnand %p594_p3, %p588_p0 }
  0xf5   :  { %v502_v30 = vpop.f32.mrb[0].mxu0 }
  0xf6   :  { %v503_v31 = vpop.f32.mrb[1].mxu0 }
  0xf7   :  { %v504_v33 = vadd.f32 %v503_v31, %v502_v30  ;;  %v542_v34 = vpop.f32.mrb[0].mxu1  ;;  %v505_v35 = vpop.f32.mrb[2].mxu0 }
  0xf8   :  { %v344_v36 = vpop.f32.mrb[1].mxu1  ;;  %v506_v37 = vpop.f32.mrb[3].mxu0 }
  0xf9   :  { %v296_v38 = vadd.f32 %v504_v33, %v453_v32  ;;  %v507_v39 = vadd.f32 %v506_v37, %v505_v35  ;;  %v543_v40 = vpop.f32.mrb[2].mxu1 }
  0xfa   :  { %v347_v41 = vpop.f32.mrb[3].mxu1 }
  0xfb   :  { %v737_v42 = vadd.f32 %v344_v36, %v296_v38  ;;  %v299_v43 = vadd.f32 %v507_v39, %v453_v32 }
  0xfd   :  { %v348_v44 = vadd.f32 %v347_v41, %v299_v43  ;;  %v508_v45 = vpop.f32.mrb[4].mxu0  ;;  %361 = vadd.xlane.f32.xlu0 %v737_v42  ;;  %v369_v55 = vmul.f32 %v737_v42, %v737_v42 }
  0xfe   :  { %v509_v46 = vpop.f32.mrb[5].mxu0 }
  0xff   :  { %v510_v47 = vadd.f32 %v509_v46, %v508_v45  ;;  %v511_v48 = vpop.f32.mrb[6].mxu0  ;;  %v370_v49 = vmul.f32 %v348_v44, %v348_v44 }
 0x100   :  { %v512_v50 = vpop.f32.mrb[7].mxu0 }
 0x101   :  { %v304_v51 = vadd.f32 %v510_v47, %v453_v32  ;;  %v513_v52 = vadd.f32 %v512_v50, %v511_v48  ;;  %375 = vadd.xlane.f32.xlu1 %v370_v49  ;;  %363 = vadd.xlane.f32.xlu0 %v348_v44 }
 0x103   :  { %v307_v53 = vadd.f32 %v513_v52, %v453_v32  ;;  %v353_v54 = vadd.f32 %v542_v34, %v304_v51 }
 0x105   :  { %365 = vadd.xlane.f32.xlu1 %v353_v54  ;;  %373 = vadd.xlane.f32.xlu0 %v369_v55  ;;  %v356_v56 = vadd.f32 %v543_v40, %v307_v53  ;;  %v371_v57 = vmul.f32 %v353_v54, %v353_v54 }
 0x107   :  { %v372_v58 = vmul.f32 %v356_v56, %v356_v56 }
 0x109   :  { %367 = vadd.xlane.f32.xlu1 %v356_v56  ;;  %377 = vadd.xlane.f32.xlu0 %v371_v57 }
 0x10d   :  { %379 = vadd.xlane.f32.xlu1 %v372_v58 }
 0x18a   :  { %v362_v59 = vpop.xlane.xlu0 %361 }
 0x18b   :  { %v381_v62 = vmul.f32 0.0078125, %v362_v59 }
 0x18d   :  { %v389_v4 = vmul.f32 %v381_v62, %v381_v62  ;;  %v397_v26 = vsub.f32 %v737_v42, %v381_v62 }
 0x18e   :  { %v376_v60 = vpop.xlane.xlu1 %375  ;;  %v364_v61 = vpop.xlane.xlu0 %363 }
 0x18f   :  { %v382_v63 = vmul.f32 0.0078125, %v364_v61  ;;  %v386_v0 = vmul.f32 0.0078125, %v376_v60 }
 0x191   :  { %v390_v1 = vmul.f32 %v382_v63, %v382_v63  ;;  %v398_v23 = vsub.f32 %v348_v44, %v382_v63 }
 0x192   :  { %v366_v2 = vpop.xlane.xlu1 %365  ;;  %v374_v3 = vpop.xlane.xlu0 %373 }
 0x193   :  { %v394_v5 = vsub.f32 %v386_v0, %v390_v1  ;;  %v383_v6 = vmul.f32 0.0078125, %v366_v2  ;;  %v385_v7 = vmul.f32 0.0078125, %v374_v3 }
 0x195   :  { %v402_v8 = vadd.f32 1e-05, %v394_v5  ;;  %v393_v9 = vsub.f32 %v385_v7, %v389_v4  ;;  %v391_v10 = vmul.f32 %v383_v6, %v383_v6  ;;  %v399_v33 = vsub.f32 %v353_v54, %v383_v6 }
 0x196   :  { %v368_v11 = vpop.xlane.xlu1 %367  ;;  %v378_v12 = vpop.xlane.xlu0 %377 }
 0x197   :  { %579 = vrsqrt.f32 %v402_v8  ;;  %v401_v13 = vadd.f32 1e-05, %v393_v9  ;;  %v384_v14 = vmul.f32 0.0078125, %v368_v11  ;;  %v387_v15 = vmul.f32 0.0078125, %v378_v12 }
 0x199   :  { %581 = vrsqrt.f32 %v401_v13  ;;  %v395_v16 = vsub.f32 %v387_v15, %v391_v10  ;;  %v392_v18 = vmul.f32 %v384_v14, %v384_v14  ;;  %v400_v38 = vsub.f32 %v356_v56, %v384_v14 }
 0x19a   :  { %v380_v17 = vpop.xlane.xlu1 %379 }
 0x19b   :  { %v403_v19 = vadd.f32 1e-05, %v395_v16  ;;  %v388_v20 = vmul.f32 0.0078125, %v380_v17 }
 0x19d   :  { %583 = vrsqrt.f32 %v403_v19  ;;  %v396_v21 = vsub.f32 %v388_v20, %v392_v18 }
 0x19f   :  { %v404_v22 = vadd.f32 1e-05, %v396_v21 }
 0x1a1   :  { %v580_v24 = vpop.eup %579  ;;  %585 = vrsqrt.f32 %v404_v22 }
 0x1a2   :  { %v410_v27 = vmul.f32 %v580_v24, %v398_v23 }
 0x1a3   :  { %v582_v28 = vpop.eup %581 }
 0x1a4   :  { %v420_v30 = vmul.f32 %v484_v25, %v410_v27  ;;  %v409_v31 = vmul.f32 %v582_v28, %v397_v26 }
 0x1a6   :  { %v430_v32 = vadd.f32 %v485_v29, %v420_v30  ;;  %v419_v34 = vmul.f32 %v484_v25, %v409_v31 }
 0x1a7   :  { %v584_v35 = vpop.eup %583 }
 0x1a8   :  { %434 = vst [vmem:[#allocation2 + $0x8] sm:$0xff] %v430_v32  ;;  %v411_v36 = vmul.f32 %v584_v35, %v399_v33  ;;  %v429_v37 = vadd.f32 %v485_v29, %v419_v34 }
 0x1aa   :  { %v421_v39 = vmul.f32 %v484_v25, %v411_v36  ;;  %433 = vst [vmem:[#allocation2] sm:$0xff] %v429_v37 }
 0x1ab   :  { %v586_v40 = vpop.eup %585 }
 0x1ac   :  { %v412_v41 = vmul.f32 %v586_v40, %v400_v38  ;;  %v431_v42 = vadd.f32 %v485_v29, %v421_v39 }
 0x1ae   :  { %v422_v43 = vmul.f32 %v484_v25, %v412_v41  ;;  %435 = vst [vmem:[#allocation2 + $0x10] sm:$0xff] %v431_v42 }
 0x1b0   :  { %v432_v44 = vadd.f32 %v485_v29, %v422_v43 }
 0x1b2   :  { %436 = vst [vmem:[#allocation2 + $0x18] sm:$0xff] %v432_v44 }
 0x1b3   :  { %598 = shalt.err (!%p595_p4)
}
 0x1b4   :  { %s599_s9 = scalar_lea.hbm %s766_s5, 512 }
 0x1b5   :  { %p600_p5 = scmp.ne.s32.totalorder %s766_s5, %s599_s9  ;;  %p603_p6 = scmp.lt.u32.totalorder %s599_s9, %s766_s5 }
 0x1b7   :  { %p605_p7 = pnand %p603_p6, %p600_p5 }
 0x1b9   :  { %608 = shalt.err (!%p605_p7)
}
 0x1ba   :  { %s612_s14 = smov 128   ;;  %s613_s15 = smov 8  }
 0x1bb   :  { %448 = dma.vmem_to_hbm [thread:$0]  %s443_s6, 512, %s766_s5, [#allocation3], %s612_s14, %s612_s14, %s613_s15  }
 0x1bc   :  { %609 = dma.done.wait [#allocation3], 512  }
 0x1bd   :  { %610 = vsyncadd [#allocation3], 4294966784 }
 0x1be   :  { %452 = vsyncpa [#allocation3], 1 }

</bundles_post_ra>
